<compile_context>
chip_gen: v6e
topology: v6e:2x2x1
jax: 0.10.0
libtpu: 0.0.40
codegen_flags: <defaults>
</compile_context>

<pallas_src>
import functools

import jax
import jax.numpy as jnp
from jax.experimental import pallas as pl
from jax.experimental.pallas import tpu as pltpu


def _aff_kernel(x_ref, y_ref, w1a_ref, w2a_ref, w1b_ref, w2b_ref, o_ref, *, inv_hw):
    # x_ref / y_ref / o_ref : (B, C, HW) block of B batch elements
    # w1a_ref / w1b_ref     : (C, Cr)   (pre-transposed first 1x1-conv weights)
    # w2a_ref / w2b_ref     : (Cr, C)   (pre-transposed second 1x1-conv weights)
    xb = x_ref[...]
    yb = y_ref[...]

    # ---- global pools over the spatial axis (f32 accumulation, bf16-safe) ----
    s = xb.astype(jnp.float32) + yb.astype(jnp.float32)       # (B, C, HW)
    avg = jnp.sum(s, axis=-1) * inv_hw                        # (B, C)
    mx = jnp.max(s, axis=-1)                                  # (B, C)

    # ---- gate MLPs: 1x1 convs on pooled vectors == small matmuls ----
    h1 = jnp.maximum(
        jnp.dot(avg, w1a_ref[...], preferred_element_type=jnp.float32), 0.0)   # (B, Cr)
    p1 = jnp.dot(h1, w2a_ref[...], preferred_element_type=jnp.float32)          # (B, C)

    h2 = jnp.maximum(
        jnp.dot(mx, w1b_ref[...], preferred_element_type=jnp.float32), 0.0)     # (B, Cr)
    p2 = jnp.dot(h2, w2b_ref[...], preferred_element_type=jnp.float32)          # (B, C)

    # out * atten + out  ==  out * (atten + 1)
    gate = (jax.nn.sigmoid(p1 + p2) + 1.0).astype(o_ref.dtype)                   # (B, C)

    # Recompute x+y at the store (VPU add is free in a mem-bound kernel) so the f32
    # pooling temporary `s` doesn't have to stay live across the gate MLP.
    o_ref[...] = ((xb + yb) * gate[:, :, None]).astype(o_ref.dtype)


def _vmem_limit_bytes():
    """Chip-aware scoped-VMEM limit: ~3/4 of physical, capped at 64 MiB.

    v7x (64 MiB physical / TC) -> 48 MiB; v5e/v6e (128 MiB) -> 64 MiB.
    Falls back to a conservative 48 MiB if the query is unavailable.
    """
    try:
        cap = pltpu.get_tpu_info().vmem_capacity_bytes
        return int(min((cap * 3) // 4, 64 * 1024 * 1024))
    except Exception:
        return 48 * 1024 * 1024


def _choose_batch_block(n, elem_bytes, budget_bytes):
    """Pick the batch-block size B.

    Preference order: even number of grid steps (balances v7x's 2 TensorCores),
    B dividing N (no wasted tail block), then the largest B within the VMEM budget.
    """
    if n <= 1:
        return 1
    max_b = max(1, min(n, budget_bytes // max(1, elem_bytes)))

    def key(b):
        g = pl.cdiv(n, b)
        return (g % 2 == 0, n % b == 0, b)

    return max(range(1, max_b + 1), key=key)


def aff_forward(x, y, w1a, w2a, w1b, w2b, *, block_bytes_budget=None):
    """x, y: (N, C, H, W).  Weights: w1a/w1b (C//r, C), w2a/w2b (C, C//r)."""
    N, C, H, W = x.shape
    HW = H * W
    Cr = w1a.shape[0]

    vmem_limit = _vmem_limit_bytes()
    if block_bytes_budget is None:
        # x, y, out double-buffered (6 blocks) + f32 pooling temp + headroom.
        block_bytes_budget = vmem_limit // 12

    # Free reshapes (NCHW is contiguous): no HBM copy, no padding, no output slice.
    x3 = x.reshape(N, C, HW)
    y3 = y.reshape(N, C, HW)

    elem_bytes = C * HW * x.dtype.itemsize
    B = _choose_batch_block(N, elem_bytes, block_bytes_budget)
    n_blocks = pl.cdiv(N, B)

    # Pre-transpose weights so the gate matmuls are (B,C)@(C,Cr) and (B,Cr)@(Cr,C).
    w1a_t, w2a_t = w1a.T, w2a.T
    w1b_t, w2b_t = w1b.T, w2b.T

    kernel = functools.partial(_aff_kernel, inv_hw=1.0 / HW)

    out3 = pl.pallas_call(
        kernel,
        out_shape=jax.ShapeDtypeStruct((N, C, HW), x.dtype),
        grid_spec=pltpu.PrefetchScalarGridSpec(
            num_scalar_prefetch=0,
            grid=(n_blocks,),
            in_specs=[
                # full-extent last two dims -> legal for any C, HW; tail N block is masked
                pl.BlockSpec((B, C, HW), lambda n: (n, 0, 0)),
                pl.BlockSpec((B, C, HW), lambda n: (n, 0, 0)),
                # weight blocks: constant index_map -> fetched once, stay resident
                pl.BlockSpec((C, Cr), lambda n: (0, 0)),
                pl.BlockSpec((Cr, C), lambda n: (0, 0)),
                pl.BlockSpec((C, Cr), lambda n: (0, 0)),
                pl.BlockSpec((Cr, C), lambda n: (0, 0)),
            ],
            out_specs=pl.BlockSpec((B, C, HW), lambda n: (n, 0, 0)),
        ),
        compiler_params=pltpu.CompilerParams(
            dimension_semantics=("parallel",),
            vmem_limit_bytes=vmem_limit,
        ),
    )(x3, y3, w1a_t, w2a_t, w1b_t, w2b_t)

    return out3.reshape(N, C, H, W)


def _reference(x, y, w1a, w2a, w1b, w2b):
    # pure-JAX reference of the PyTorch forward
    out = x + y
    avg = jnp.mean(out, axis=(2, 3))          # (N, C)
    mx = jnp.max(out, axis=(2, 3))            # (N, C)
    p1 = jnp.maximum(avg @ w1a.T, 0.0) @ w2a.T
    p2 = jnp.maximum(mx @ w1b.T, 0.0) @ w2b.T
    atten = jax.nn.sigmoid(p1 + p2)[:, :, None, None]
    return out * atten + out


def _run_case(N, C, H, W, reduction, key):
    Cr = C // reduction
    kx, ky, k1, k2, k3, k4 = jax.random.split(key, 6)

    x = jax.random.normal(kx, (N, C, H, W), dtype=jnp.float32)
    y = jax.random.normal(ky, (N, C, H, W), dtype=jnp.float32)

    # deterministic 1x1-conv weights (bias=False), shapes (out_ch, in_ch)
    w1a = jax.random.normal(k1, (Cr, C), dtype=jnp.float32) * 0.1
    w2a = jax.random.normal(k2, (C, Cr), dtype=jnp.float32) * 0.1
    w1b = jax.random.normal(k3, (Cr, C), dtype=jnp.float32) * 0.1
    w2b = jax.random.normal(k4, (C, Cr), dtype=jnp.float32) * 0.1

    out = aff_forward(x, y, w1a, w2a, w1b, w2b)
    jax.block_until_ready(out)

    ref = _reference(x, y, w1a, w2a, w1b, w2b)
    assert jnp.allclose(out, ref, atol=1e-5, rtol=1e-5), f"mismatch vs reference for {(N, C, H, W)}"


if __name__ == "__main__":
    key = jax.random.PRNGKey(0)
    ka, kb = jax.random.split(key)
    # lane-aligned spatial size (HW=256), even grid
    _run_case(4, 32, 16, 16, 8, ka)
    # non-multiple-of-128 spatial size (HW=100) + partial tail batch block
    _run_case(5, 32, 10, 10, 8, kb)
    print("KERNEL_OK")
</pallas_src>

<mosaic_0001>
module attributes {stable_mosaic.version = 11 : i64} {
  func.func @_aff_kernel(%arg0: i32, %arg1: memref<2x32x256xf32, #tpu.memory_space<vmem>>, %arg2: memref<2x32x256xf32, #tpu.memory_space<vmem>>, %arg3: memref<32x4xf32, #tpu.memory_space<vmem>>, %arg4: memref<4x32xf32, #tpu.memory_space<vmem>>, %arg5: memref<32x4xf32, #tpu.memory_space<vmem>>, %arg6: memref<4x32xf32, #tpu.memory_space<vmem>>, %arg7: memref<2x32x256xf32, #tpu.memory_space<vmem>>) attributes {dimension_semantics = [#tpu.dimension_semantics<parallel>], iteration_bounds = array<i64: 2>, scalar_prefetch = 0 : i64, scratch_operands = 0 : i64, tpu.core_type = #tpu.core_type<tc>, window_params = [{transform_indices = @transform_0, window_bounds = array<i64: 2, 32, 256>}, {transform_indices = @transform_1, window_bounds = array<i64: 2, 32, 256>}, {pipeline_mode = #tpu.pipeline_mode<synchronous>, transform_indices = @transform_2, window_bounds = array<i64: 32, 4>}, {pipeline_mode = #tpu.pipeline_mode<synchronous>, transform_indices = @transform_3, window_bounds = array<i64: 4, 32>}, {pipeline_mode = #tpu.pipeline_mode<synchronous>, transform_indices = @transform_4, window_bounds = array<i64: 32, 4>}, {pipeline_mode = #tpu.pipeline_mode<synchronous>, transform_indices = @transform_5, window_bounds = array<i64: 4, 32>}, {transform_indices = @transform_6, window_bounds = array<i64: 2, 32, 256>}]} {
    %c0 = arith.constant 0 : index
    %c0_0 = arith.constant 0 : index
    %c0_1 = arith.constant 0 : index
    %0 = vector.load %arg1[%c0, %c0_0, %c0_1] : memref<2x32x256xf32, #tpu.memory_space<vmem>>, vector<2x32x256xf32>
    %c0_2 = arith.constant 0 : index
    %c0_3 = arith.constant 0 : index
    %c0_4 = arith.constant 0 : index
    %1 = vector.load %arg2[%c0_2, %c0_3, %c0_4] : memref<2x32x256xf32, #tpu.memory_space<vmem>>, vector<2x32x256xf32>
    %2 = arith.addf %0, %1 : vector<2x32x256xf32>
    %cst = arith.constant dense<0.000000e+00> : vector<2x32xf32>
    %3 = vector.multi_reduction <add>, %2, %cst [2] : vector<2x32x256xf32> to vector<2x32xf32>
    %cst_5 = arith.constant 3.906250e-03 : f32
    %4 = vector.broadcast %cst_5 : f32 to vector<2x32xf32>
    %5 = arith.mulf %3, %4 : vector<2x32xf32>
    %cst_6 = arith.constant dense<0xFF800000> : vector<2x32xf32>
    %6 = vector.multi_reduction <maximumf>, %2, %cst_6 [2] : vector<2x32x256xf32> to vector<2x32xf32>
    %c0_7 = arith.constant 0 : index
    %c0_8 = arith.constant 0 : index
    %7 = vector.load %arg3[%c0_7, %c0_8] : memref<32x4xf32, #tpu.memory_space<vmem>>, vector<32x4xf32>
    %cst_9 = arith.constant dense<0.000000e+00> : vector<2x4xf32>
    %8 = tpu.matmul %5, %7, %cst_9 {dimension_numbers = #tpu.dot_dimension_numbers<[1], [0], [0], [1], [0, 0, 1, 1], [], []>} : vector<2x32xf32>, vector<32x4xf32>, vector<2x4xf32> -> vector<2x4xf32>
    %cst_10 = arith.constant 0.000000e+00 : f32
    %9 = vector.broadcast %cst_10 : f32 to vector<2x4xf32>
    %10 = arith.maximumf %8, %9 : vector<2x4xf32>
    %c0_11 = arith.constant 0 : index
    %c0_12 = arith.constant 0 : index
    %11 = vector.load %arg4[%c0_11, %c0_12] : memref<4x32xf32, #tpu.memory_space<vmem>>, vector<4x32xf32>
    %cst_13 = arith.constant dense<0.000000e+00> : vector<2x32xf32>
    %12 = tpu.matmul %10, %11, %cst_13 {dimension_numbers = #tpu.dot_dimension_numbers<[1], [0], [0], [1], [0, 0, 1, 1], [], []>} : vector<2x4xf32>, vector<4x32xf32>, vector<2x32xf32> -> vector<2x32xf32>
    %c0_14 = arith.constant 0 : index
    %c0_15 = arith.constant 0 : index
    %13 = vector.load %arg5[%c0_14, %c0_15] : memref<32x4xf32, #tpu.memory_space<vmem>>, vector<32x4xf32>
    %cst_16 = arith.constant dense<0.000000e+00> : vector<2x4xf32>
    %14 = tpu.matmul %6, %13, %cst_16 {dimension_numbers = #tpu.dot_dimension_numbers<[1], [0], [0], [1], [0, 0, 1, 1], [], []>} : vector<2x32xf32>, vector<32x4xf32>, vector<2x4xf32> -> vector<2x4xf32>
    %cst_17 = arith.constant 0.000000e+00 : f32
    %15 = vector.broadcast %cst_17 : f32 to vector<2x4xf32>
    %16 = arith.maximumf %14, %15 : vector<2x4xf32>
    %c0_18 = arith.constant 0 : index
    %c0_19 = arith.constant 0 : index
    %17 = vector.load %arg6[%c0_18, %c0_19] : memref<4x32xf32, #tpu.memory_space<vmem>>, vector<4x32xf32>
    %cst_20 = arith.constant dense<0.000000e+00> : vector<2x32xf32>
    %18 = tpu.matmul %16, %17, %cst_20 {dimension_numbers = #tpu.dot_dimension_numbers<[1], [0], [0], [1], [0, 0, 1, 1], [], []>} : vector<2x4xf32>, vector<4x32xf32>, vector<2x32xf32> -> vector<2x32xf32>
    %19 = arith.addf %12, %18 : vector<2x32xf32>
    %20 = arith.negf %19 : vector<2x32xf32>
    %21 = math.exp %20 : vector<2x32xf32>
    %cst_21 = arith.constant 1.000000e+00 : f32
    %22 = vector.broadcast %cst_21 : f32 to vector<2x32xf32>
    %23 = arith.addf %22, %21 : vector<2x32xf32>
    %24 = arith.divf %22, %23 : vector<2x32xf32>
    %cst_22 = arith.constant 1.000000e+00 : f32
    %25 = vector.broadcast %cst_22 : f32 to vector<2x32xf32>
    %26 = arith.addf %24, %25 : vector<2x32xf32>
    %27 = arith.addf %0, %1 : vector<2x32x256xf32>
    %28 = vector.shape_cast %26 : vector<2x32xf32> to vector<2x32x1xf32>
    %29 = vector.broadcast %28 : vector<2x32x1xf32> to vector<2x32x256xf32>
    %30 = arith.mulf %27, %29 : vector<2x32x256xf32>
    %c0_23 = arith.constant 0 : index
    %c0_24 = arith.constant 0 : index
    %c0_25 = arith.constant 0 : index
    %31 = vector.load %arg7[%c0_23, %c0_24, %c0_25] : memref<2x32x256xf32, #tpu.memory_space<vmem>>, vector<2x32x256xf32>
    tpu.vector_store %arg7[%c0_23, %c0_24, %c0_25], %30 {strides = array<i32>} : memref<2x32x256xf32, #tpu.memory_space<vmem>>, vector<2x32x256xf32>,
    return
  }
  func.func @transform_0(%arg0: i32) -> (i32, i32, i32) {
    %c0_i32 = arith.constant 0 : i32
    %c0_i32_0 = arith.constant 0 : i32
    %c0_i32_1 = arith.constant 0 : i32
    return %arg0, %c0_i32, %c0_i32_0 : i32, i32, i32
  }
  func.func @transform_1(%arg0: i32) -> (i32, i32, i32) {
    %c0_i32 = arith.constant 0 : i32
    %c0_i32_0 = arith.constant 0 : i32
    %c0_i32_1 = arith.constant 0 : i32
    return %arg0, %c0_i32, %c0_i32_0 : i32, i32, i32
  }
  func.func @transform_2(%arg0: i32) -> (i32, i32) {
    %c0_i32 = arith.constant 0 : i32
    %c0_i32_0 = arith.constant 0 : i32
    %c0_i32_1 = arith.constant 0 : i32
    return %c0_i32, %c0_i32_0 : i32, i32
  }
  func.func @transform_3(%arg0: i32) -> (i32, i32) {
    %c0_i32 = arith.constant 0 : i32
    %c0_i32_0 = arith.constant 0 : i32
    %c0_i32_1 = arith.constant 0 : i32
    return %c0_i32, %c0_i32_0 : i32, i32
  }
  func.func @transform_4(%arg0: i32) -> (i32, i32) {
    %c0_i32 = arith.constant 0 : i32
    %c0_i32_0 = arith.constant 0 : i32
    %c0_i32_1 = arith.constant 0 : i32
    return %c0_i32, %c0_i32_0 : i32, i32
  }
  func.func @transform_5(%arg0: i32) -> (i32, i32) {
    %c0_i32 = arith.constant 0 : i32
    %c0_i32_0 = arith.constant 0 : i32
    %c0_i32_1 = arith.constant 0 : i32
    return %c0_i32, %c0_i32_0 : i32, i32
  }
  func.func @transform_6(%arg0: i32) -> (i32, i32, i32) {
    %c0_i32 = arith.constant 0 : i32
    %c0_i32_0 = arith.constant 0 : i32
    %c0_i32_1 = arith.constant 0 : i32
    return %arg0, %c0_i32, %c0_i32_0 : i32, i32, i32
  }
}

</mosaic_0001>

<bundles_post_ra>
// kernel: tpu_custom_call.1
= control target key start
LH: loop header
LB: loop body
LE: loop exit
PB: predicated region body
PF: predicated region fallthrough
CT: control target
= control target key end

     0   :  { %s1762_s0 = inlined_call_operand.hbm [shape: f32[4,32,256], index: 0, kind: input, shape index: {}]   ;;  %s1763_s1 = inlined_call_operand.hbm [shape: f32[4,32,256], index: 1, kind: input, shape index: {}]   ;;  %s1764_s2 = inlined_call_operand.vmem [shape: f32[32,4], index: 2, kind: input, shape index: {}]   ;;  %s1765_s3 = inlined_call_operand.vmem [shape: f32[4,32], index: 3, kind: input, shape index: {}]   ;;  %s1766_s4 = inlined_call_operand.vmem [shape: f32[32,4], index: 4, kind: input, shape index: {}]   ;;  %s1767_s5 = inlined_call_operand.vmem [shape: f32[4,32], index: 5, kind: input, shape index: {}]   ;;  %s1768_s6 = inlined_call_operand.hbm [shape: f32[4,32,256], index: 6, kind: output, shape index: {}]  }
   0x1   :  { %1773 = sst [smem:[#allocation11_spill]] %s1762_s0 }
   0x2   :  { %11 = vsyncpa [#allocation3], 0 }
   0x3   :  { %13 = vsyncpa [#allocation3 + $0x1], 0 }
   0x4   :  { %14 = vsyncpa [#allocation6], 0 }
   0x5   :  { %16 = vsyncpa [#allocation6 + $0x1], 0 }
   0x6   :  { %17 = vsyncpa [#allocation4], 0 }
   0x7   :  { %19 = vsyncpa [#allocation4 + $0x1], 0  ;;  %s1332_s21 = smov 0   ;;  %s1334_s22 = smov 0  }
   0x8   :  { %s1336_s23 = smov 0   ;;  %s1338_s24 = smov 0  }
   0x9 LB: > { %s1353_s25 = sadd.s32 4294967295, %s1286_s24   ;;  %s1021_s26 = sadd.s32 4294967294, %s1286_s24   ;;  %s1286_s24 = sphi %s1338_s24, %s1790_s24   ;;  %s1282_s23 = sphi %s1336_s23, %s1789_s23   ;;  %s1278_s22 = sphi %s1334_s22, %s1788_s22   ;;  %s1274_s21 = sphi %s1332_s21, %s1787_s21  }
   0xa   : > { %s1357_s27 = sadd.s32 1, %s1286_s24   ;;  %s32_s28 = sadd.s32 1, %s1282_s23 }
   0xb   : > { %s29_s29 = ssub.s32 %s1286_s24, %s1357_s27  ;;  %p39_p0 = scmp.ne.s32.totalorder %s1282_s23, %s1278_s22 }
   0xc   : > { %p30_p1 = scmp.eq.s32.totalorder %s29_s29, 0  ;;  %p40_p2 = scmp.eq.s32.totalorder %s1286_s24, 0 }
   0xd   : > { %p45_p3 = scmp.ne.s32.totalorder %s1278_s22, %s1274_s21  ;;  %p46_p4 = scmp.eq.s32.totalorder %s1353_s25, 0 }
   0xe   : > { %s1369_s30 = scalar_select %p30_p1, %s1282_s23, %s32_s28  }
   0xf   : > { %p1371_p5 = por %p40_p2, %p39_p0  ;;  %p1375_p6 = por %p46_p4, %p45_p3 }
  0x10   : > { %p179_p7 = scmp.eq.s32.totalorder %s1353_s25, 1  ;;  %p185_p8 = scmp.eq.s32.totalorder %s1021_s26, 1 }
  0x11   : > { %s1775_s8 = scalar_select %p1375_p6, 1, 0 }
  0x12   : > { %p1118_p10 = scmp.lt.s32.totalorder %s1286_s24, 2  ;;  %p1382_p11 = por %p179_p7, %p39_p0 }
  0x13   : > { %p1386_p12 = por %p185_p8, %p45_p3  ;;  %s1391_s11 = sand.u32 1, %s1282_s23  }
  0x14   : > { %s1776_s9 = scalar_select %p1382_p11, 1, 0 }
  0x15   : > { %s1777_s10 = scalar_select %p1386_p12, 1, 0 }
  0x16   : > { %s1050_s12 = sshll.u32 %s1286_s24, 11  ;;  %s1769_s13 = sshll.u32 %s1391_s11, 7 }
  0x17   : > { %s1778_s0 = sld [smem:[#allocation11_spill]]  ;;  %s221_s17 = scalar_lea.vmem [#allocation2], %s1769_s13 }
  0x18   : > { %s229_s18 = sshll.u32 %s221_s17, 4  ;;  %p1406_p13 = pnand %p1118_p10, %p1371_p5  ;;  %s1410_s18 = int_to_ptr.vmem [resolvable:$true] %s229_s18 }
  0x19   : > { %s218_s20 = scalar_lea.sflag [#allocation3], %s1391_s11 }
  0x1a   : > { %p1164_p1 = pneg %p1406_p13 }
  0x1d   : > { %s1400_s16 = scalar_lea.hbm %s1778_s0, %s1050_s12  ;;  %s1167_s7 = scalar_lea.hbm %s1778_s0, 4096 }
  0x1e   : > { %s1162_s26 = scalar_lea.hbm %s1400_s16, 2048  ;;  %p1168_p4 = scmp.lt.s32.totalorder %s1400_s16, %s1778_s0 }
  0x1f   : > { %p1163_p0 = scmp.ne.s32.totalorder %s1400_s16, %s1162_s26  ;;  %p1169_p5 = scmp.lt.s32.totalorder %s1167_s7, %s1162_s26 }
  0x21   : > { %p1165_p2 = pnand %p1164_p1, %p1163_p0  ;;  %p1170_p7 = por %p1169_p5, %p1168_p4 }
  0x23   : > { %p1166_p3 = pneg %p1165_p2 }
  0x25   : > { %p1171_p8 = pnand %p1170_p7, %p1166_p3 }
  0x27   : > { %1174 = shalt.err (!%p1171_p8)
}
  0x28   : > { %s1175_s17 = scalar_lea.vmem %s1410_s18, 2048  ;;  %s1288_s28 = smov [#allocation2]  }
  0x29   : > { %p1176_p10 = scmp.ne.s32.totalorder %s1410_s18, %s1175_s17  ;;  %s1180_s29 = sshll.u32 %s1288_s28, 4  ;;  %s1181_s29 = int_to_ptr.vmem [resolvable:$false] %s1180_s29 }
  0x2a   : > { %s1182_s13 = scalar_lea.vmem %s1181_s29, 4096  ;;  %p1183_p9 = scmp.lt.s32.totalorder %s1410_s18, %s1181_s29 }
  0x2b   : > { %p1178_p0 = pnand %p1176_p10, %p1164_p1  ;;  %p1184_p12 = scmp.lt.s32.totalorder %s1182_s13, %s1175_s17 }
  0x2d   : > { %p1179_p2 = pneg %p1178_p0  ;;  %p1185_p11 = por %p1184_p12, %p1183_p9 }
  0x2f   : > { %p1186_p4 = pnand %p1185_p11, %p1179_p2 }
  0x31   : > { %1189 = shalt.err (!%p1186_p4)
}
  0x32   : > { %s1771_s26 = smov 256   ;;  %s1290_s7 = smov 16  }
  0x33   : > { %1110 = dma.hbm_to_vmem [thread:$0]  (!%p1406_p13), %s1400_s16, 2048, %s1410_s18, %s218_s20, %s1771_s26, %s1771_s26, %s1290_s7  }
  0x34   : > { %p1032_p9 = scmp.ge.s32.totalorder %s1286_s24, 1  ;;  %p259_p11 = scmp.lt.s32.totalorder %s1286_s24, 3 }
  0x35   : > { %s1453_s17 = scalar_lea.hbm %s1763_s1, %s1050_s12  ;;  %s1781_s28 = sshll.u32 %s1391_s11, 7 }
  0x36   : > { %p1444_p12 = pnand %p1032_p9, %p259_p11  ;;  %s243_s29 = scalar_lea.vmem [#allocation5], %s1781_s28 }
  0x37   : > { %s251_s0 = sshll.u32 %s243_s29, 4  ;;  %s240_s16 = scalar_lea.sflag [#allocation6], %s1391_s11  ;;  %s1457_s0 = int_to_ptr.vmem [resolvable:$true] %s251_s0 }
  0x38   : > { %s1190_s18 = scalar_lea.hbm %s1453_s17, 2048  ;;  %s1195_s12 = scalar_lea.hbm %s1763_s1, 4096 }
  0x39   : > { %p1191_p3 = scmp.ne.s32.totalorder %s1453_s17, %s1190_s18  ;;  %p1196_p8 = scmp.lt.s32.totalorder %s1453_s17, %s1763_s1 }
  0x3a   : > { %p1197_p10 = scmp.lt.s32.totalorder %s1195_s12, %s1190_s18 }
  0x3b   : > { %p1193_p5 = pnand %p1191_p3, %p1164_p1 }
  0x3c   : > { %p1198_p0 = por %p1197_p10, %p1196_p8 }
  0x3d   : > { %p1194_p7 = pneg %p1193_p5 }
  0x3f   : > { %p1199_p2 = pnand %p1198_p0, %p1194_p7 }
  0x41   : > { %1202 = shalt.err (!%p1199_p2)
}
  0x42   : > { %s1203_s11 = scalar_lea.vmem %s1457_s0, 2048  ;;  %s1291_s26 = smov [#allocation5]  }
  0x43   : > { %p1204_p4 = scmp.ne.s32.totalorder %s1457_s0, %s1203_s11  ;;  %s1208_s28 = sshll.u32 %s1291_s26, 4  ;;  %s1209_s28 = int_to_ptr.vmem [resolvable:$false] %s1208_s28 }
  0x44   : > { %s1210_s29 = scalar_lea.vmem %s1209_s28, 4096  ;;  %p1211_p3 = scmp.lt.s32.totalorder %s1457_s0, %s1209_s28 }
  0x45   : > { %p1206_p9 = pnand %p1204_p4, %p1164_p1  ;;  %p1212_p5 = scmp.lt.s32.totalorder %s1210_s29, %s1203_s11 }
  0x47   : > { %p1207_p11 = pneg %p1206_p9  ;;  %p1213_p6 = por %p1212_p5, %p1211_p3 }
  0x49   : > { %p1214_p8 = pnand %p1213_p6, %p1207_p11 }
  0x4b   : > { %1217 = shalt.err (!%p1214_p8)
}
  0x4c   : > { %s1782_s18 = smov 256   ;;  %263 = sbr.rel (%p1444_p12) target bundleno = 835 (0x343), region = 44 }
  0x4d   : > { %1113 = dma.hbm_to_vmem [thread:$0]  (!%p1406_p13), %s1453_s17, 2048, %s1457_s0, %s240_s16, %s1782_s18, %s1782_s18, %s1290_s7  }
  0x4e   : > { %s1488_s20 = sand.u32 (!%p1444_p12), 1, %s1278_s22   ;;  %p1783_p6 = scmp.ne.s32.totalorder (!%p1444_p12), %s1775_s8, 0 }
  0x4f   : > { %s1491_s12 = sshll.u32 (!%p1444_p12), %s1488_s20, 7  ;;  %s266_s14 = scalar_lea.sflag (!%p1444_p12), [#allocation3], %s1488_s20 }
  0x50   : > { %s1495_s19 = scalar_lea.vmem (!%p1444_p12), [#allocation2], %s1491_s12 }
  0x51   : > { %1261 = dma.done.wait (%p1783_p6), %s266_s14, 2048  }
  0x52   : > { %1263 = vsyncadd (%p1783_p6), %s266_s14, 4294965248  ;;  %s275_s0 = scalar_lea.sflag [#allocation6], %s1488_s20  ;;  %s1503_s7 = scalar_lea.vmem [#allocation5], %s1491_s12 }
  0x53   : > { %1265 = dma.done.wait (%p1783_p6), %s275_s0, 2048  }
  0x54   : > { %1267 = vsyncadd (%p1783_p6), %s275_s0, 4294965248  ;;  %v323_v0 = vld [vmem:[%s1495_s19 + $0x40] sm:$0xff]  ;;  %v324_v1 = vld [vmem:[%s1495_s19 + $0x48] sm:$0xff]  ;;  %v1292_v62 = vmov 0.0   ;;  %vm1293_vm0 = vmmov 0   ;;  %vm442_vm1 = vcmask 130112  }
  0x55   : > { %v339_v2 = vld [vmem:[%s1503_s7 + $0x40] sm:$0xff]  ;;  %v340_v3 = vld [vmem:[%s1503_s7 + $0x48] sm:$0xff]  ;;  %v325_v10 = vld [vmem:[%s1495_s19 + $0x50] sm:$0xff]  ;;  %1069 = vmatprep.subr.mxu0 %v1292_v62  ;;  %1080 = vmatprep.subr.mxu1 %v1292_v62  ;;  %vm449_vm2 = vcmask 195712   ;;  %vm456_vm3 = vcmask 261312   ;;  %vm477_vm4 = vcmask 1041409  }
  0x56   : > { %v1513_v4 = vadd.f32 %v339_v2, %v323_v0  ;;  %v315_v5 = vld [vmem:[%s1495_s19] sm:$0xff]  ;;  %v316_v6 = vld [vmem:[%s1495_s19 + $0x8] sm:$0xff]  ;;  %v1517_v7 = vadd.f32 %v340_v3, %v324_v1  ;;  %v326_v13 = vld [vmem:[%s1495_s19 + $0x58] sm:$0xff]  ;;  %1077 = vmatprep.mubr.msk.f32.mxu0 %vm1293_vm0, %v1292_v62  ;;  %1088 = vmatprep.mubr.msk.f32.mxu1 %vm1293_vm0, %v1292_v62  ;;  %vm479_vm5 = vcmask 261120   ;;  %vm683_vm6 = vcmask 1043456   ;;  %s1682_s26 = scalar_lea.vmem [#allocation7], %s1491_s12 }
  0x57   : > { %v331_v8 = vld [vmem:[%s1503_s7] sm:$0xff]  ;;  %v332_v9 = vld [vmem:[%s1503_s7 + $0x8] sm:$0xff]  ;;  %v341_v14 = vld [vmem:[%s1503_s7 + $0x50] sm:$0xff]  ;;  %vm679_vm7 = vcmask 31744   ;;  %s1054_s12 = sshll.u32 %s1353_s25, 11  ;;  %s925_s28 = sshll.u32 %s1682_s26, 4  ;;  %s1715_s28 = int_to_ptr.vmem [resolvable:$true] %s925_s28 }
  0x58   : > { %v1522_v11 = vadd.f32 %v331_v8, %v315_v5  ;;  %v1524_v12 = vadd.f32 %v332_v9, %v316_v6  ;;  %v342_v15 = vld [vmem:[%s1503_s7 + $0x58] sm:$0xff]  ;;  %v375_v16 = vadd.f32 %v1517_v7, %v1513_v4  ;;  %v1531_v17 = vadd.f32 %v341_v14, %v325_v10  ;;  %v317_v19 = vld [vmem:[%s1495_s19 + $0x10] sm:$0xff]  ;;  %v327_v25 = vld [vmem:[%s1495_s19 + $0x60] sm:$0xff]  ;;  %s1713_s14 = scalar_lea.hbm %s1768_s6, %s1054_s12  ;;  %s911_s25 = scalar_lea.sflag [#allocation4], %s1488_s20 }
  0x59   : > { %v1533_v18 = vadd.f32 %v342_v15, %v326_v13  ;;  %v318_v20 = vld [vmem:[%s1495_s19 + $0x18] sm:$0xff]  ;;  %v333_v21 = vld [vmem:[%s1503_s7 + $0x10] sm:$0xff]  ;;  %v328_v26 = vld [vmem:[%s1495_s19 + $0x68] sm:$0xff]  ;;  %v407_v59 = vmax.f32 %v1513_v4, %v1517_v7  ;;  %v431_v13 = vlaneseq  ;;  %p1784_p1 = scmp.ne.s32.totalorder %s1776_s9, 0  ;;  %s1294_s0 = smov [#allocation7]  }
  0x5a   : > { %v363_v22 = vadd.f32 %v1524_v12, %v1522_v11  ;;  %v334_v23 = vld [vmem:[%s1503_s7 + $0x18] sm:$0xff]  ;;  %v1541_v24 = vadd.f32 %v333_v21, %v317_v19  ;;  %376 = vadd.xlane.f32.xlu1 %v375_v16  ;;  %v343_v29 = vld [vmem:[%s1503_s7 + $0x60] sm:$0xff]  ;;  %v344_v30 = vld [vmem:[%s1503_s7 + $0x68] sm:$0xff]  ;;  %v395_v57 = vmax.f32 %v1522_v11, %v1524_v12 }
  0x5b   : > { %v378_v27 = vadd.f32 %v1533_v18, %v1531_v17  ;;  %v1547_v28 = vadd.f32 %v334_v23, %v318_v20  ;;  %v319_v31 = vld [vmem:[%s1495_s19 + $0x20] sm:$0xff]  ;;  %v1552_v32 = vadd.f32 %v343_v29, %v327_v25  ;;  %v1554_v33 = vadd.f32 %v344_v30, %v328_v26  ;;  %v320_v34 = vld [vmem:[%s1495_s19 + $0x28] sm:$0xff]  ;;  %v329_v40 = vld [vmem:[%s1495_s19 + $0x70] sm:$0xff] }
  0x5c   : > { %364 = vadd.xlane.f32.xlu0 %v363_v22  ;;  %v335_v35 = vld [vmem:[%s1503_s7 + $0x20] sm:$0xff]  ;;  %v336_v36 = vld [vmem:[%s1503_s7 + $0x28] sm:$0xff]  ;;  %v330_v41 = vld [vmem:[%s1495_s19 + $0x78] sm:$0xff]  ;;  %v410_v58 = vmax.f32 %v1531_v17, %v1533_v18  ;;  %v432_v15 = vand.u32 127, %v431_v13  ;;  %v1643_v22 = vshrl.u32 %v431_v13, 7 }
  0x5d   : > { %v366_v37 = vadd.f32 %v1547_v28, %v1541_v24  ;;  %v1561_v38 = vadd.f32 %v335_v35, %v319_v31  ;;  %v1563_v39 = vadd.f32 %v336_v36, %v320_v34  ;;  %v345_v42 = vld [vmem:[%s1503_s7 + $0x70] sm:$0xff]  ;;  %v346_v43 = vld [vmem:[%s1503_s7 + $0x78] sm:$0xff]  ;;  %v381_v46 = vadd.f32 %v1554_v33, %v1552_v32  ;;  %v420_v3 = vld [vmem:[%s1764_s2 + $0x8] sm:$0xff] }
  0x5e   : > { %v321_v44 = vld [vmem:[%s1495_s19 + $0x30] sm:$0xff]  ;;  %v322_v45 = vld [vmem:[%s1495_s19 + $0x38] sm:$0xff]  ;;  %379 = vadd.xlane.f32.xlu1 %v378_v27  ;;  %v1573_v47 = vadd.f32 %v345_v42, %v329_v40  ;;  %v1575_v48 = vadd.f32 %v346_v43, %v330_v41  ;;  %v398_v56 = vmax.f32 %v1541_v24, %v1547_v28  ;;  %v413_v60 = vmax.f32 %v1552_v32, %v1554_v33  ;;  %v419_v5 = vld [vmem:[%s1764_s2] sm:$0xff]  ;;  %s1218_s19 = scalar_lea.vmem %s1715_s28, 2048 }
  0x5f   : > { %v337_v49 = vld [vmem:[%s1503_s7 + $0x30] sm:$0xff]  ;;  %v338_v50 = vld [vmem:[%s1503_s7 + $0x38] sm:$0xff]  ;;  %v369_v51 = vadd.f32 %v1563_v39, %v1561_v38  ;;  %v401_v61 = vmax.f32 %v1561_v38, %v1563_v39  ;;  %v555_v9 = vld [vmem:[%s1766_s4 + $0x8] sm:$0xff]  ;;  %v437_v19 = vadd.s32 4294967288, %v432_v15  ;;  %v444_v21 = vadd.s32 4294967280, %v432_v15  ;;  %p1219_p13 = scmp.ne.s32.totalorder %s1715_s28, %s1218_s19  ;;  %s1222_s7 = sshll.u32 %s1294_s0, 4  ;;  %s1223_s7 = int_to_ptr.vmem [resolvable:$false] %s1222_s7 }
  0x60   : > { %367 = vadd.xlane.f32.xlu0 %v366_v37  ;;  %v1581_v52 = vadd.f32 %v337_v49, %v321_v44  ;;  %v1583_v53 = vadd.f32 %v338_v50, %v322_v45  ;;  %v384_v54 = vadd.f32 %v1575_v48, %v1573_v47  ;;  %v422_v63 = vld [vmem:[%s1764_s2 + $0x18] sm:$0xff]  ;;  %v421_v0 = vld [vmem:[%s1764_s2 + $0x10] sm:$0xff]  ;;  %v416_v1 = vmax.f32 %v1573_v47, %v1575_v48  ;;  %v554_v10 = vld [vmem:[%s1766_s4] sm:$0xff]  ;;  %s1224_s8 = scalar_lea.vmem %s1223_s7, 4096  ;;  %p1225_p10 = scmp.lt.s32.totalorder %s1715_s28, %s1223_s7 }
  0x61   : > { %1070 = vmatpush3.msra.mxu0 %v422_v63  ;;  %v557_v6 = vld [vmem:[%s1766_s4 + $0x18] sm:$0xff]  ;;  %v556_v8 = vld [vmem:[%s1766_s4 + $0x10] sm:$0xff]  ;;  %v440_v25 = vsub.s32 %v437_v19, %v1643_v22  ;;  %v451_v27 = vadd.s32 4294967272, %v432_v15  ;;  %v447_v30 = vsub.s32 %v444_v21, %v1643_v22  ;;  %v435_v34 = vsub.s32 %v432_v15, %v1643_v22  ;;  %p1220_p12 = pnand %p1219_p13, %p1784_p1  ;;  %p1226_p0 = scmp.lt.s32.totalorder %s1224_s8, %s1218_s19 }
  0x62   : > { %382 = vadd.xlane.f32.xlu1 %v381_v46  ;;  %v372_v55 = vadd.f32 %v1583_v53, %v1581_v52  ;;  %1071 = vmatprep.subr.mxu0 %v1292_v62  ;;  %v404_v2 = vmax.f32 %v1581_v52, %v1583_v53 }
  0x63   : > { %1072 = vmatpush3.msra.mxu0 %v421_v0  ;;  %1081 = vmatpush3.msra.mxu1 %v557_v6  ;;  %v454_v43 = vsub.s32 %v451_v27, %v1643_v22  ;;  %p1221_p7 = pneg %p1220_p12  ;;  %p1227_p2 = por %p1226_p0, %p1225_p10 }
  0x64   : > { %370 = vadd.xlane.f32.xlu0 %v369_v51  ;;  %1073 = vmatprep.subr.mxu0 %v1292_v62 }
  0x65   : > { %1074 = vmatpush3.msra.mxu0 %v420_v3  ;;  %1082 = vmatprep.subr.mxu1 %v1292_v62  ;;  %p1228_p4 = pnand %p1227_p2, %p1221_p7 }
  0x66   : > { %385 = vadd.xlane.f32.xlu1 %v384_v54  ;;  %1075 = vmatprep.subr.mxu0 %v1292_v62 }
  0x67   : > { %1076 = vmatpush3.msra.mxu0 %v419_v5  ;;  %1083 = vmatpush3.msra.mxu1 %v556_v8 }
  0x68   : > { %373 = vadd.xlane.f32.xlu0 %v372_v55  ;;  %1091 = vmatprep.subr.mxu0 %v1292_v62 }
  0x69   : > { %1084 = vmatprep.subr.mxu1 %v1292_v62 }
  0x6a   : > { %399 = vmax.xlane.f32.xlu1 %v398_v56  ;;  %1085 = vmatpush3.msra.mxu1 %v555_v9 }
  0x6b   : > { %1086 = vmatprep.subr.mxu1 %v1292_v62 }
  0x6c   : > { %396 = vmax.xlane.f32.xlu0 %v395_v57  ;;  %1087 = vmatpush3.msra.mxu1 %v554_v10 }
  0x6d   : > { %1096 = vmatprep.subr.mxu1 %v1292_v62 }
  0x6e   : > { %411 = vmax.xlane.f32.xlu1 %v410_v58 }
  0x70   : > { %408 = vmax.xlane.f32.xlu0 %v407_v59 }
  0x72   : > { %414 = vmax.xlane.f32.xlu1 %v413_v60 }
  0x74   : > { %402 = vmax.xlane.f32.xlu0 %v401_v61 }
  0x76   : > { %417 = vmax.xlane.f32.xlu1 %v416_v1 }
  0x78   : > { %405 = vmax.xlane.f32.xlu0 %v404_v2 }
  0xe3   : > { %v377_v14 = vpop.xlane.xlu1 %376 }
  0xe4   : > { %v391_v35 = vmul.f32 0.00390625, %v377_v14 }
  0xe5   : > { %v365_v16 = vpop.xlane.xlu0 %364 }
  0xe6   : > { %v387_v40 = vmul.f32 0.00390625, %v365_v16  ;;  %v461_v49 = vrot.slane %v391_v35, %v435_v34 }
  0xe7   : > { %v380_v20 = vpop.xlane.xlu1 %379 }
  0xe8   : > { %v392_v26 = vmul.f32 0.00390625, %v380_v20  ;;  %v436_v55 = vrot.slane %v387_v40, %v435_v34 }
  0xe9   : > { %v368_v23 = vpop.xlane.xlu0 %367 }
  0xea   : > { %v388_v29 = vmul.f32 0.00390625, %v368_v23  ;;  %v465_v42 = vrot.slane %v392_v26, %v440_v25 }
  0xeb   : > { %v383_v31 = vpop.xlane.xlu1 %382 }
  0xec   : > { %v393_v36 = vmul.f32 0.00390625, %v383_v31  ;;  %v441_v44 = vrot.slane %v388_v29, %v440_v25  ;;  %v466_v57 = vsel %vm442_vm1, %v465_v42, %v461_v49 }
  0xed   : > { %v371_v37 = vpop.xlane.xlu0 %370 }
  0xee   : > { %v389_v41 = vmul.f32 0.00390625, %v371_v37  ;;  %v470_v45 = vrot.slane %v393_v36, %v447_v30  ;;  %v443_v59 = vsel %vm442_vm1, %v441_v44, %v436_v55 }
  0xef   : > { %v386_v46 = vpop.xlane.xlu1 %385 }
  0xf0   : > { %v448_v50 = vrot.slane %v389_v41, %v447_v30  ;;  %v394_v51 = vmul.f32 0.00390625, %v386_v46  ;;  %v471_v60 = vsel %vm449_vm2, %v470_v45, %v466_v57 }
  0xf1   : > { %v374_v54 = vpop.xlane.xlu0 %373 }
  0xf2   : > { %v390_v56 = vmul.f32 0.00390625, %v374_v54  ;;  %v475_v58 = vrot.slane %v394_v51, %v454_v43  ;;  %v450_v0 = vsel %vm449_vm2, %v448_v50, %v443_v59 }
  0xf3   : > { %v400_v63 = vpop.xlane.xlu1 %399 }
  0xf4   : > { %v455_v61 = vrot.slane %v390_v56, %v454_v43  ;;  %v476_v2 = vsel %vm456_vm3, %v475_v58, %v471_v60  ;;  %v573_v15 = vrot.slane %v400_v63, %v440_v25  ;;  %v842_v58 = vsub.s32 0, %v1643_v22 }
  0xf5   : > { %v397_v1 = vpop.xlane.xlu0 %396  ;;  %v861_v63 = vsub.s32 1, %v1643_v22 }
  0xf6   : > { %v457_v3 = vsel %vm456_vm3, %v455_v61, %v450_v0  ;;  %v569_v16 = vrot.slane %v397_v1, %v435_v34 }
  0xf7   : > { %v478_v5 = vsel %vm477_vm4, %v476_v2, %v457_v3  ;;  %v412_v6 = vpop.xlane.xlu1 %411 }
  0xf8   : > { %1078 = vmatmul.mubr.msk.f32.vlgmr.msra.gmra.mxu0 %vm479_vm5, %v478_v5  ;;  %v592_v10 = vrot.slane %v412_v6, %v440_v25  ;;  %v574_v29 = vsel %vm442_vm1, %v573_v15, %v569_v16 }
  0xf9   : > { %v409_v8 = vpop.xlane.xlu0 %408  ;;  %1093 = vmatprep.mubr.msk.f32.mxu0 %vm1293_vm0, %v1292_v62 }
  0xfa   : > { %v588_v13 = vrot.slane %v409_v8, %v435_v34  ;;  %v678_v34 = vld [vmem:[%s1767_s5] sm:$0xf] }
  0xfb   : > { %v415_v9 = vpop.xlane.xlu1 %414  ;;  %1092 = vmatpush3.msk.msra.mxu0 %vm683_vm6, %v678_v34 }
  0xfc   : > { %v597_v19 = vrot.slane %v415_v9, %v447_v30  ;;  %v593_v23 = vsel %vm442_vm1, %v592_v10, %v588_v13 }
  0xfd   : > { %v403_v14 = vpop.xlane.xlu0 %402 }
  0xfe   : > { %v578_v20 = vrot.slane %v403_v14, %v447_v30  ;;  %v598_v31 = vsel %vm449_vm2, %v597_v19, %v593_v23  ;;  %v553_v30 = vld [vmem:[%s1765_s3] sm:$0xf] }
  0xff   : > { %v418_v21 = vpop.xlane.xlu1 %417 }
 0x100   : > { %v602_v26 = vrot.slane %v418_v21, %v454_v43  ;;  %v579_v36 = vsel %vm449_vm2, %v578_v20, %v574_v29 }
 0x101   : > { %v406_v27 = vpop.xlane.xlu0 %405 }
 0x102   : > { %v583_v35 = vrot.slane %v406_v27, %v454_v43  ;;  %v603_v37 = vsel %vm456_vm3, %v602_v26, %v598_v31 }
 0x104   : > { %v584_v40 = vsel %vm456_vm3, %v583_v35, %v579_v36 }
 0x105   : > { %v604_v25 = vsel %vm477_vm4, %v603_v37, %v584_v40 }
 0x106   : > { %1089 = vmatmul.mubr.msk.f32.vlgmr.msra.gmra.mxu1 %vm479_vm5, %v604_v25 }
 0x107   : > { %1098 = vmatprep.mubr.msk.f32.mxu1 %vm1293_vm0, %v1292_v62  ;;  %1097 = vmatpush3.msk.msra.mxu1 %vm683_vm6, %v553_v30 }
 0x1b8   : > { %v548_v41 = vpop.f32.mrf.mxu0 }
 0x1b9   : > { %v552_v42 = vmax.f32 %v548_v41, 0.0 }
 0x1ba   : > { %v1079_v43 = vpop.f32.mrf.mxu0 }
 0x1bb   : > { %1099 = vmatmul.mubr.msk.f32.vlgmr.msra.gmra.mxu1 %vm679_vm7, %v552_v42 }
 0x1c6   : > { %v673_v44 = vpop.f32.mrf.mxu1 }
 0x1c7   : > { %v677_v45 = vmax.f32 %v673_v44, 0.0 }
 0x1c8   : > { %v1090_v46 = vpop.f32.mrf.mxu1 }
 0x1c9   : > { %1094 = vmatmul.mubr.msk.f32.vlgmr.msra.gmra.mxu0 %vm679_vm7, %v677_v45 }
 0x27b   : > { %v829_v62 = vpop.f32.mrf.mxu1 }
 0x27d   : > { %v1100_v49 = vpop.f32.mrf.mxu1 }
 0x289   : > { %v753_v50 = vpop.f32.mrf.mxu0 }
 0x28a   : > { %v830_v51 = vadd.f32 %v829_v62, %v753_v50 }
 0x28b   : > { %v1095_v54 = vpop.f32.mrf.mxu0 }
 0x28c   : > { %v1042_v55 = vmul.f32 -1.442695, %v830_v51 }
 0x28e   : > { %1158 = vpow2.f32 %v1042_v55 }
 0x29b   : > { %v1159_v56 = vpop.eup %1158 }
 0x29c   : > { %v836_v57 = vadd.f32 1.0, %v1159_v56 }
 0x29e   : > { %1160 = vrcp.f32 %v836_v57 }
 0x2ab   : > { %v1161_v59 = vpop.eup %1160 }
 0x2ac   : > { %v839_v60 = vadd.f32 1.0, %v1161_v59 }
 0x2ae   : > { %v843_v61 = vrot.slane %v839_v60, %v842_v58  ;;  %v862_v0 = vrot.slane %v839_v60, %v861_v63 }
 0x2b0   : > { %849 = vbcast.lane.b32.xlu1 %v843_v61, 264  ;;  %845 = vbcast.lane.b32.xlu0 %v843_v61, 256 }
 0x2b4   : > { %853 = vbcast.lane.b32.xlu1 %v843_v61, 272  ;;  %864 = vbcast.lane.b32.xlu0 %v862_v0, 256 }
 0x2b8   : > { %857 = vbcast.lane.b32.xlu1 %v843_v61, 280  ;;  %872 = vbcast.lane.b32.xlu0 %v862_v0, 272 }
 0x2bc   : > { %868 = vbcast.lane.b32.xlu1 %v862_v0, 264 }
 0x2c0   : > { %876 = vbcast.lane.b32.xlu1 %v862_v0, 280 }
 0x322   : > { %v850_v1 = vpop.permute.xlu1 %849  ;;  %v846_v2 = vpop.permute.xlu0 %845 }
 0x323   : > { %v880_v3 = vmul.f32 %v850_v1, %v1541_v24  ;;  %v881_v5 = vmul.f32 %v850_v1, %v1547_v28  ;;  %v878_v6 = vmul.f32 %v846_v2, %v1522_v11  ;;  %v879_v22 = vmul.f32 %v846_v2, %v1524_v12 }
 0x325   : > { %896 = vst [vmem:[%s1682_s26 + $0x10] sm:$0xff] %v880_v3  ;;  %897 = vst [vmem:[%s1682_s26 + $0x18] sm:$0xff] %v881_v5 }
 0x326   : > { %894 = vst [vmem:[%s1682_s26] sm:$0xff] %v878_v6  ;;  %895 = vst [vmem:[%s1682_s26 + $0x8] sm:$0xff] %v879_v22  ;;  %v854_v24 = vpop.permute.xlu1 %853  ;;  %v865_v28 = vpop.permute.xlu0 %864 }
 0x327   : > { %v882_v11 = vmul.f32 %v854_v24, %v1561_v38  ;;  %v883_v12 = vmul.f32 %v854_v24, %v1563_v39  ;;  %v886_v8 = vmul.f32 %v865_v28, %v1513_v4  ;;  %v887_v9 = vmul.f32 %v865_v28, %v1517_v7 }
 0x329   : > { %898 = vst [vmem:[%s1682_s26 + $0x20] sm:$0xff] %v882_v11  ;;  %899 = vst [vmem:[%s1682_s26 + $0x28] sm:$0xff] %v883_v12 }
 0x32a   : > { %902 = vst [vmem:[%s1682_s26 + $0x40] sm:$0xff] %v886_v8  ;;  %903 = vst [vmem:[%s1682_s26 + $0x48] sm:$0xff] %v887_v9  ;;  %v858_v10 = vpop.permute.xlu1 %857  ;;  %v873_v13 = vpop.permute.xlu0 %872 }
 0x32b   : > { %v884_v38 = vmul.f32 %v858_v10, %v1581_v52  ;;  %v885_v14 = vmul.f32 %v858_v10, %v1583_v53  ;;  %v890_v39 = vmul.f32 %v873_v13, %v1552_v32  ;;  %v891_v4 = vmul.f32 %v873_v13, %v1554_v33 }
 0x32d   : > { %900 = vst [vmem:[%s1682_s26 + $0x30] sm:$0xff] %v884_v38  ;;  %901 = vst [vmem:[%s1682_s26 + $0x38] sm:$0xff] %v885_v14 }
 0x32e   : > { %906 = vst [vmem:[%s1682_s26 + $0x60] sm:$0xff] %v890_v39  ;;  %907 = vst [vmem:[%s1682_s26 + $0x68] sm:$0xff] %v891_v4  ;;  %v869_v7 = vpop.permute.xlu1 %868 }
 0x32f   : > { %v888_v15 = vmul.f32 %v869_v7, %v1531_v17  ;;  %v889_v16 = vmul.f32 %v869_v7, %v1533_v18 }
 0x331   : > { %904 = vst [vmem:[%s1682_s26 + $0x50] sm:$0xff] %v888_v15  ;;  %905 = vst [vmem:[%s1682_s26 + $0x58] sm:$0xff] %v889_v16 }
 0x332   : > { %v877_v32 = vpop.permute.xlu1 %876 }
 0x333   : > { %v892_v17 = vmul.f32 %v877_v32, %v1573_v47  ;;  %v893_v33 = vmul.f32 %v877_v32, %v1575_v48 }
 0x335   : > { %908 = vst [vmem:[%s1682_s26 + $0x70] sm:$0xff] %v892_v17  ;;  %909 = vst [vmem:[%s1682_s26 + $0x78] sm:$0xff] %v893_v33 }
 0x336   : > { %1231 = shalt.err (!%p1228_p4)
}
 0x337   : > { %s1232_s13 = scalar_lea.hbm %s1713_s14, 2048  ;;  %s1236_s15 = scalar_lea.hbm %s1768_s6, 4096 }
 0x338   : > { %p1233_p9 = scmp.ne.s32.totalorder %s1713_s14, %s1232_s13  ;;  %p1237_p5 = scmp.lt.s32.totalorder %s1713_s14, %s1768_s6 }
 0x339   : > { %p1238_p8 = scmp.lt.s32.totalorder %s1236_s15, %s1232_s13 }
 0x33a   : > { %p1234_p11 = pnand %p1233_p9, %p1784_p1 }
 0x33b   : > { %p1239_p6 = por %p1238_p8, %p1237_p5 }
 0x33c   : > { %p1235_p3 = pneg %p1234_p11 }
 0x33e   : > { %p1240_p13 = pnand %p1239_p6, %p1235_p3 }
 0x340   : > { %1243 = shalt.err (!%p1240_p13)
}
 0x341   : > { %s1295_s12 = smov 256   ;;  %s1296_s29 = smov 16  }
 0x342   : > { %1105 = dma.vmem_to_hbm [thread:$0]  (%p1784_p1), %s1715_s28, 2048, %s1713_s14, %s911_s25, %s1295_s12, %s1295_s12, %s1296_s29  }
 0x343 PF: > { %s940_s18 = sand.u32 1, %s1274_s21   ;;  %p1785_p12 = scmp.ne.s32.totalorder %s1777_s10, 0 }
 0x344   : > { %p1786_p7 = scmp.ge.s32.totalorder %s1286_s24, 2  ;;  %s941_s19 = scalar_lea.sflag [#allocation4], %s940_s18 }
 0x346   : > { %p1115_p10 = pnand %p1786_p7, %p1785_p12 }
 0x348   : > { %p1116_p0 = pneg %p1115_p10 }
 0x34a   : > { %1269 = dma.done.wait (%p1116_p0), %s941_s19, 2048  }
 0x34b   : > { %1271 = vsyncadd (%p1116_p0), %s941_s19, 4294965248  ;;  %p22_p2 = scmp.ge.s32.totalorder %s1357_s27, 4   ;;  %s1787_s21 = smov %s1278_s22 }
 0x34c   : > { %s1788_s22 = smov %s1282_s23  ;;  %s1789_s23 = smov %s1369_s30 }
 0x34d   : > { %s1790_s24 = smov %s1357_s27  ;;  %24 = sbr.rel (!%p22_p2) target bundleno = 9 (0x9), region = 102 }
 0x352   :  { %946 = vsyncpa [#allocation3], 1 }
 0x353   :  { %948 = vsyncpa [#allocation3 + $0x1], 1 }
 0x354   :  { %949 = vsyncpa [#allocation6], 1 }
 0x355   :  { %951 = vsyncpa [#allocation6 + $0x1], 1 }
 0x356   :  { %952 = vsyncpa [#allocation4], 1 }
 0x357   :  { %954 = vsyncpa [#allocation4 + $0x1], 1 }

</bundles_post_ra>
